<compile_context>
chip_gen: v6e
topology: v6e:2x2x1
jax: 0.10.0
libtpu: 0.0.40
codegen_flags: <defaults>
</compile_context>

<pallas_src>
import functools

import jax
import jax.numpy as jnp
from jax import lax
from jax.experimental import pallas as pl
from jax.experimental.pallas import tpu as pltpu

_LANES = 128
_SUBLANES = 8
_VREG_ELEMS = _SUBLANES * _LANES  # 1024 f32 elements


@functools.lru_cache(maxsize=None)
def _vmem_capacity_bytes():
    try:
        return int(pltpu.get_tpu_info().vmem_capacity_bytes)
    except Exception:
        return 64 << 20  # conservative fallback (v7x-sized)


@functools.lru_cache(maxsize=None)
def _num_tensorcores():
    """2 on v7x-class (2 TC/chip) devices, 1 on v5e/v6e."""
    try:
        kind = jax.devices()[0].device_kind.lower()
    except Exception:
        return 1
    return 2 if ("v7" in kind or "7x" in kind) else 1


def _sse_kernel(c_ref, x_ref, o_ref, *, row_block, total_rows,
                blocks_per_core, num_blocks, need_mask):
    core = pl.program_id(0)   # TensorCore shard (size 1 on v5e/v6e)
    step = pl.program_id(1)   # streaming reduction axis

    @pl.when(step == 0)
    def _init():
        o_ref[...] = jnp.zeros_like(o_ref)

    c = c_ref[...].astype(jnp.float32)
    x = x_ref[...].astype(jnp.float32)

    def _accumulate(d):
        # (row_block,128) -> (row_block//8, 8, 128): the axis-0 sum is pure
        # vreg-granular adds; the final 8x128 collapse is done in JAX.
        psum = jnp.sum((d * d).reshape(row_block // _SUBLANES, _SUBLANES, _LANES),
                       axis=0)
        o_ref[...] += psum[None]

    if not need_mask:
        _accumulate(c - x)
    else:
        block_idx = core * blocks_per_core + step
        is_boundary = block_idx >= num_blocks - 1

        @pl.when(jnp.logical_not(is_boundary))
        def _fast():  # interior blocks: no iota/compare/select
            _accumulate(c - x)

        @pl.when(is_boundary)
        def _masked():
            # Zero rows past the true end of the data: the partial trailing
            # block and (on the 2-core split) the clamped overrun block.
            row = (block_idx * row_block
                   + lax.broadcasted_iota(jnp.int32, (row_block, _LANES), 0))
            _accumulate(jnp.where(row < total_rows, c - x, 0.0))


def _sum_squared_error_2d(c2d, x2d, *, max_row_block=None):
    """sum((c2d - x2d)**2) over a (rows, 128) slab; rows must be a multiple of 8."""
    rows, lanes = x2d.shape
    assert lanes == _LANES and c2d.shape == x2d.shape
    assert rows % _SUBLANES == 0 and rows > 0

    itemsize = max(jnp.dtype(c2d.dtype).itemsize, jnp.dtype(x2d.dtype).itemsize)
    vmem_cap = _vmem_capacity_bytes()

    if max_row_block is None:
        # 2 inputs x 2 pipeline buffers must fit in ~vmem_cap/5, leaving room
        # for Mosaic's block-sized f32 temporaries.  v5e/v6e (128 MiB VMEM):
        # ~6 MiB/block; v7x (64 MiB): ~3 MiB/block.
        budget = min(vmem_cap // 5, 24 << 20)
        max_row_block = max(_SUBLANES,
                            (budget // (2 * 2 * _LANES * itemsize))
                            // _SUBLANES * _SUBLANES)
    assert max_row_block % _SUBLANES == 0

    row_block = min(max_row_block, rows)
    num_blocks = -(-rows // row_block)                      # ceil div

    num_cores = _num_tensorcores() if num_blocks >= 2 else 1
    blocks_per_core = -(-num_blocks // num_cores)           # ceil div
    need_mask = (num_cores * blocks_per_core * row_block) != rows

    def in_map(c, i):
        b = c * blocks_per_core + i
        # Overrun steps (odd block count on the 2-core split) are clamped to a
        # valid block; their contribution is zeroed by the in-kernel mask.
        return (jnp.minimum(b, num_blocks - 1), 0)

    kernel = functools.partial(
        _sse_kernel, row_block=row_block, total_rows=rows,
        blocks_per_core=blocks_per_core, num_blocks=num_blocks,
        need_mask=need_mask)

    if num_cores == 2:
        dim_sem = (pltpu.CORE_PARALLEL, pltpu.ARBITRARY)
    else:
        dim_sem = (pltpu.ARBITRARY, pltpu.ARBITRARY)

    out_nbytes = num_cores * _SUBLANES * _LANES * 4
    cost = pl.CostEstimate(
        flops=3 * rows * _LANES, transcendentals=0,
        bytes_accessed=int(c2d.nbytes) + int(x2d.nbytes) + out_nbytes)

    partials = pl.pallas_call(
        kernel,
        out_shape=jax.ShapeDtypeStruct((num_cores, _SUBLANES, _LANES), jnp.float32),
        grid_spec=pltpu.PrefetchScalarGridSpec(
            num_scalar_prefetch=0,
            grid=(num_cores, blocks_per_core),
            in_specs=[pl.BlockSpec((row_block, _LANES), in_map),
                      pl.BlockSpec((row_block, _LANES), in_map)],
            out_specs=pl.BlockSpec((1, _SUBLANES, _LANES), lambda c, i: (c, 0, 0)),
        ),
        compiler_params=pltpu.CompilerParams(
            dimension_semantics=dim_sem,
            vmem_limit_bytes=int(vmem_cap // 2)),
        cost_estimate=cost,
    )(c2d, x2d)

    # Tiny final reduce (num_cores * 8 * 128 floats) in plain JAX.
    return jnp.sum(partials)


def _split_vreg_aligned(flat):
    """Split a flat array into an (8k, 128) kernel slab and a <1024-elem tail."""
    total = flat.shape[0]
    main = (total // _VREG_ELEMS) * _VREG_ELEMS
    prefix = flat[:main].reshape(main // _LANES, _LANES)
    tail = flat[main:]
    return prefix, tail


@jax.jit
def content_mse(content, x):
    """MSE(content, x) with mean reduction (mse_loss default), via Pallas."""
    assert content.shape == x.shape, "content and x must have identical shapes"
    total = x.size

    c2d, c_tail = _split_vreg_aligned(jnp.reshape(content, (-1,)))
    x2d, x_tail = _split_vreg_aligned(jnp.reshape(x, (-1,)))

    if c2d.shape[0] > 0:
        sse = _sum_squared_error_2d(c2d, x2d)
    else:
        sse = jnp.float32(0.0)

    if c_tail.shape[0] > 0:
        # Ragged tail (< 1024 elements): trivial plain-JAX reduce, no HBM pad
        # copy of the full tensors.
        dt = c_tail.astype(jnp.float32) - x_tail.astype(jnp.float32)
        sse = sse + jnp.sum(dt * dt)

    return sse / jnp.float32(total)


class ContentLossProbe:
    """JAX/Pallas equivalent of the PyTorch ContentLossProbe module."""

    def __init__(self, content):
        # .detach() in PyTorch -> stop_gradient here.
        self.content = jax.lax.stop_gradient(jnp.asarray(content))
        self.loss = -1.0

    def __call__(self, x):
        # TODO(synk): `self.loss` is a Python-attribute side effect; inside a
        # jax.jit'd region use the functional `content_mse(content, x)` instead.
        self.loss = content_mse(self.content, x)
        return x  # module returns its input unchanged


if __name__ == "__main__":
    key = jax.random.PRNGKey(0)
    k_content, k_x = jax.random.split(key)

    # NCHW, small shapes: batch=2, channels=4, spatial=16x16
    shape = (2, 4, 16, 16)
    content = jax.random.normal(k_content, shape, dtype=jnp.float32)
    x = jax.random.normal(k_x, shape, dtype=jnp.float32)

    probe = ContentLossProbe(content)
    out = probe(x)

    out = jax.block_until_ready(out)
    loss = jax.block_until_ready(probe.loss)

    # Sanity check against plain-JAX reference (mean squared error).
    ref = jnp.mean((content - x) ** 2)
    assert out.shape == x.shape
    assert jnp.allclose(out, x)
    assert jnp.allclose(loss, ref, rtol=1e-5, atol=1e-6), (loss, ref)

    # Extra coverage: larger slab (2,4,400,200) and a non-multiple-of-1024
    # ragged tail (2,3,17,11).
    for seed, extra_shape in [(1, (2, 4, 400, 200)), (2, (2, 3, 17, 11))]:
        kc, kx = jax.random.split(jax.random.PRNGKey(seed))
        c2 = jax.random.normal(kc, extra_shape, dtype=jnp.float32)
        x2 = jax.random.normal(kx, extra_shape, dtype=jnp.float32)
        got = jax.block_until_ready(content_mse(c2, x2))
        want = jnp.mean((c2 - x2) ** 2)
        assert jnp.allclose(got, want, rtol=1e-4, atol=1e-6), (extra_shape, got, want)

    # Multi-block streaming + boundary-only masking (and the 2-TC split when
    # running on a 2-core chip): 1000 rows with a forced 64-row block.
    kc, kx = jax.random.split(jax.random.PRNGKey(3))
    c3 = jax.random.normal(kc, (1000, _LANES), dtype=jnp.float32)
    x3 = jax.random.normal(kx, (1000, _LANES), dtype=jnp.float32)
    got = jax.block_until_ready(_sum_squared_error_2d(c3, x3, max_row_block=64))
    want = jnp.sum((c3 - x3) ** 2)
    assert jnp.allclose(got, want, rtol=1e-4, atol=1e-4), (got, want)

    print("KERNEL_OK")
</pallas_src>

<mosaic_0001>
module attributes {stable_mosaic.version = 11 : i64} {
  func.func @_sse_kernel(%arg0: i32, %arg1: i32, %arg2: memref<16x128xf32, #tpu.memory_space<vmem>>, %arg3: memref<16x128xf32, #tpu.memory_space<vmem>>, %arg4: memref<1x8x128xf32, #tpu.memory_space<vmem>>) attributes {dimension_semantics = [#tpu.dimension_semantics<arbitrary>, #tpu.dimension_semantics<arbitrary>], iteration_bounds = array<i64: 1, 1>, scalar_prefetch = 0 : i64, scratch_operands = 0 : i64, tpu.core_type = #tpu.core_type<tc>, window_params = [{transform_indices = @transform_0, window_bounds = array<i64: 16, 128>}, {transform_indices = @transform_1, window_bounds = array<i64: 16, 128>}, {transform_indices = @transform_2, window_bounds = array<i64: 1, 8, 128>}]} {
    %c0_i32 = arith.constant 0 : i32
    %0 = arith.cmpi eq, %arg1, %c0_i32 : i32
    %1 = arith.extui %0 : i1 to i32
    %c0_i32_0 = arith.constant 0 : i32
    %2 = arith.cmpi ne, %1, %c0_i32_0 : i32
    scf.if %2 {
      %cst_10 = arith.constant 0.000000e+00 : f32
      %13 = vector.broadcast %cst_10 : f32 to vector<1x8x128xf32>
      %c0_11 = arith.constant 0 : index
      %c0_12 = arith.constant 0 : index
      %c0_13 = arith.constant 0 : index
      %14 = vector.load %arg4[%c0_11, %c0_12, %c0_13] : memref<1x8x128xf32, #tpu.memory_space<vmem>>, vector<1x8x128xf32>
      tpu.vector_store %arg4[%c0_11, %c0_12, %c0_13], %13 {strides = array<i32>} : memref<1x8x128xf32, #tpu.memory_space<vmem>>, vector<1x8x128xf32>,
    } else {
    }
    %c0 = arith.constant 0 : index
    %c0_1 = arith.constant 0 : index
    %3 = vector.load %arg2[%c0, %c0_1] : memref<16x128xf32, #tpu.memory_space<vmem>>, vector<16x128xf32>
    %c0_2 = arith.constant 0 : index
    %c0_3 = arith.constant 0 : index
    %4 = vector.load %arg3[%c0_2, %c0_3] : memref<16x128xf32, #tpu.memory_space<vmem>>, vector<16x128xf32>
    %5 = arith.subf %3, %4 : vector<16x128xf32>
    %6 = arith.mulf %5, %5 : vector<16x128xf32>
    %7 = vector.shape_cast %6 : vector<16x128xf32> to vector<2x8x128xf32>
    %cst = arith.constant dense<0.000000e+00> : vector<8x128xf32>
    %8 = vector.multi_reduction <add>, %7, %cst [0] : vector<2x8x128xf32> to vector<8x128xf32>
    %c0_4 = arith.constant 0 : index
    %c0_5 = arith.constant 0 : index
    %c0_6 = arith.constant 0 : index
    %9 = vector.load %arg4[%c0_4, %c0_5, %c0_6] : memref<1x8x128xf32, #tpu.memory_space<vmem>>, vector<1x8x128xf32>
    %10 = vector.shape_cast %8 : vector<8x128xf32> to vector<1x8x128xf32>
    %11 = arith.addf %9, %10 : vector<1x8x128xf32>
    %c0_7 = arith.constant 0 : index
    %c0_8 = arith.constant 0 : index
    %c0_9 = arith.constant 0 : index
    %12 = vector.load %arg4[%c0_7, %c0_8, %c0_9] : memref<1x8x128xf32, #tpu.memory_space<vmem>>, vector<1x8x128xf32>
    tpu.vector_store %arg4[%c0_7, %c0_8, %c0_9], %11 {strides = array<i32>} : memref<1x8x128xf32, #tpu.memory_space<vmem>>, vector<1x8x128xf32>,
    return
  }
  func.func @transform_0(%arg0: i32, %arg1: i32) -> (i32, i32) {
    %c1_i32 = arith.constant 1 : i32
    %0 = arith.muli %arg0, %c1_i32 : i32
    %1 = arith.addi %0, %arg1 : i32
    %c0_i32 = arith.constant 0 : i32
    %2 = arith.minsi %1, %c0_i32 : i32
    %c0_i32_0 = arith.constant 0 : i32
    %c0_i32_1 = arith.constant 0 : i32
    return %2, %c0_i32_0 : i32, i32
  }
  func.func @transform_1(%arg0: i32, %arg1: i32) -> (i32, i32) {
    %c1_i32 = arith.constant 1 : i32
    %0 = arith.muli %arg0, %c1_i32 : i32
    %1 = arith.addi %0, %arg1 : i32
    %c0_i32 = arith.constant 0 : i32
    %2 = arith.minsi %1, %c0_i32 : i32
    %c0_i32_0 = arith.constant 0 : i32
    %c0_i32_1 = arith.constant 0 : i32
    return %2, %c0_i32_0 : i32, i32
  }
  func.func @transform_2(%arg0: i32, %arg1: i32) -> (i32, i32, i32) {
    %c0_i32 = arith.constant 0 : i32
    %c0_i32_0 = arith.constant 0 : i32
    %c0_i32_1 = arith.constant 0 : i32
    return %arg0, %c0_i32, %c0_i32_0 : i32, i32, i32
  }
}

</mosaic_0001>

<bundles_post_ra>
// kernel: content_mse.1
= control target key start
LH: loop header
LB: loop body
LE: loop exit
PB: predicated region body
PF: predicated region fallthrough
CT: control target
= control target key end

     0   :  { %s139_s0 = inlined_call_operand.vmem [shape: f32[16,128], index: 0, kind: input, shape index: {}]   ;;  %s140_s1 = inlined_call_operand.vmem [shape: f32[16,128], index: 1, kind: input, shape index: {}]   ;;  %s141_s2 = inlined_call_operand.vmem [shape: f32[1,8,128], index: 2, kind: output, shape index: {}]  }
   0x1   :  { %v80_v0 = vld [vmem:[%s139_s0] sm:$0xff]  ;;  %v81_v1 = vld [vmem:[%s139_s0 + $0x8] sm:$0xff] }
   0x2   :  { %v82_v2 = vld [vmem:[%s140_s1] sm:$0xff]  ;;  %v83_v3 = vld [vmem:[%s140_s1 + $0x8] sm:$0xff] }
   0x3   :  { %v84_v4 = vsub.f32 %v80_v0, %v82_v2  ;;  %v85_v5 = vsub.f32 %v81_v1, %v83_v3 }
   0x5   :  { %v86_v6 = vmul.f32 %v84_v4, %v84_v4  ;;  %v87_v7 = vmul.f32 %v85_v5, %v85_v5 }
   0x7   :  { %v88_v8 = vadd.f32 %v87_v7, %v86_v6 }
   0x9   :  { %91 = vst [vmem:[%s141_s2] sm:$0xff] %v88_v8 }

</bundles_post_ra>
